<compile_context>
chip_gen: v6e
topology: v6e:2x2x1
jax: 0.10.0
libtpu: 0.0.40
codegen_flags: <defaults>
</compile_context>

<pallas_src>
import jax
import jax.numpy as jnp
from jax.experimental import pallas as pl
from jax.experimental.pallas import tpu as pltpu

TWO_PI = 6.283185          # matches the PyTorch literal exactly
MAX_TILE_M = 128 * 1024    # lanes/block: 3*128K*4B = 1.5 MiB in + 1.5 MiB out


def _round_up(x, m):
    return ((x + m - 1) // m) * m


def _choose_tile_m(m, n_batch):
    """Lane-tile size for the flattened pixel axis (multiple of 128 or full dim)."""
    if m <= MAX_TILE_M:
        # A full-extent block is always layout-legal.  If the batch alone can't
        # feed both v7x TensorCores, split the pixel axis into two tiles.
        if n_batch == 1 and m > 2 * 128:
            return _round_up(pl.cdiv(m, 2), 128)
        return m
    return MAX_TILE_M


def conv1x1_kernel(wb_ref, x_ref, o_ref):
    """out[o, t] = sum_k w[o, k] * x[k, t] + (bias[o] - 2*pi).

    wb_ref: (C_OUT, C_IN + 1) f32 VMEM -- column k is weight[:, k], last column
            is bias - 2*pi (the -2*pi is folded on the host).
    x_ref : (C_IN, T) input-dtype VMEM block (channels on sublanes, flattened
            zero-padded pixels on lanes).
    o_ref : (C_OUT, T) f32 VMEM block.
    """
    cin = x_ref.shape[0]
    # (1, T) * (C_OUT, 1) broadcasts to (C_OUT, T): each FMA covers all output
    # channels at once instead of one scalar*vector per (out, in) pair.
    acc = x_ref[0:1, :].astype(jnp.float32) * wb_ref[:, 0:1]
    for k in range(1, cin):
        acc = acc + x_ref[k:k + 1, :].astype(jnp.float32) * wb_ref[:, k:k + 1]
    o_ref[...] = acc + wb_ref[:, cin:cin + 1]


@jax.jit
def model_forward(x_nchw, weight, bias):
    """Conv2d(C->C, k=1, s=1, p=1)(x) - 2*pi.  x: (N,C,H,W) -> (N,C,H+2,W+2)."""
    n, cin, h, w = x_nchw.shape
    cout = bias.shape[0]
    hp, wp = h + 2, w + 2
    m = hp * wp

    # Zero-pad once; the 1x1 conv over the zero border *is* the border value
    # (bias - 2*pi), so the kernel produces the final output with no epilogue.
    x_pad = jnp.pad(x_nchw, ((0, 0), (0, 0), (1, 1), (1, 1)))
    x_flat = x_pad.reshape(n, cin, m)                      # free (contiguous)

    w2 = weight.reshape(cout, -1).astype(jnp.float32)      # (O, I), squeezes 1x1
    b_fold = bias.astype(jnp.float32) - TWO_PI              # fold the -2*pi
    wb = jnp.concatenate([w2, b_fold[:, None]], axis=1)     # (O, I + 1)

    tile_m = _choose_tile_m(m, n)
    grid_m = pl.cdiv(m, tile_m)

    out_flat = pl.pallas_call(
        conv1x1_kernel,
        out_shape=jax.ShapeDtypeStruct((n, cout, m), jnp.float32),
        grid_spec=pltpu.PrefetchScalarGridSpec(
            num_scalar_prefetch=0,
            grid=(n, grid_m),
            in_specs=[
                pl.BlockSpec((cout, cin + 1), lambda b, i: (0, 0)),       # tiny
                pl.BlockSpec((None, cin, tile_m), lambda b, i: (b, 0, i)),
            ],
            out_specs=pl.BlockSpec((None, cout, tile_m),
                                   lambda b, i: (b, 0, i)),
        ),
        compiler_params=pltpu.CompilerParams(
            dimension_semantics=("parallel", "parallel")),
    )(wb, x_flat)

    return out_flat.reshape(n, cout, hp, wp)


def _reference(x, weight, bias):
    cout = bias.shape[0]
    x_pad = jnp.pad(x, ((0, 0), (0, 0), (1, 1), (1, 1)))
    w2 = weight.reshape(cout, -1)
    return (jnp.einsum("oc,nchw->nohw", w2, x_pad)
            + bias.reshape(1, cout, 1, 1) - TWO_PI)


if __name__ == "__main__":
    key = jax.random.PRNGKey(0)
    kx, kx2, kw, kb = jax.random.split(key, 4)

    # Small shapes consistent with the module: Conv2d(3, 3, 1, padding=1)
    N, C, H, W = 2, 3, 16, 16
    x1 = jax.random.normal(kx, (N, C, H, W), dtype=jnp.float32)

    # deterministic PyTorch-style uniform init for a 1x1 conv (weight is OIHW)
    fan_in = C * 1 * 1
    bound = 1.0 / (fan_in ** 0.5)
    weight = jax.random.uniform(kw, (C, C, 1, 1), jnp.float32, -bound, bound)
    bias = jax.random.uniform(kb, (C,), jnp.float32, -bound, bound)

    out = model_forward(x1, weight, bias)
    jax.block_until_ready(out)
    assert out.shape == (N, C, H + 2, W + 2)
    assert jnp.allclose(out, _reference(x1, weight, bias), atol=1e-5, rtol=1e-5)

    # Also exercise the spec's own shape (1,3,64,64): single image split into
    # two lane tiles (megacore-friendly) with a ragged, masked last block.
    x2 = jax.random.normal(kx2, (1, C, 64, 64), dtype=jnp.float32)
    out2 = model_forward(x2, weight, bias)
    jax.block_until_ready(out2)
    assert out2.shape == (1, C, 66, 66)
    assert jnp.allclose(out2, _reference(x2, weight, bias), atol=1e-5, rtol=1e-5)

    print("KERNEL_OK")
</pallas_src>

<mosaic_0001>
module attributes {stable_mosaic.version = 11 : i64} {
  func.func @conv1x1_kernel(%arg0: i32, %arg1: i32, %arg2: memref<3x4xf32, #tpu.memory_space<vmem>>, %arg3: memref<1x3x324xf32, #tpu.memory_space<vmem>>, %arg4: memref<1x3x324xf32, #tpu.memory_space<vmem>>) attributes {dimension_semantics = [#tpu.dimension_semantics<parallel>, #tpu.dimension_semantics<parallel>], iteration_bounds = array<i64: 2, 1>, scalar_prefetch = 0 : i64, scratch_operands = 0 : i64, tpu.core_type = #tpu.core_type<tc>, window_params = [{pipeline_mode = #tpu.pipeline_mode<synchronous>, transform_indices = @transform_0, window_bounds = array<i64: 3, 4>}, {transform_indices = @transform_1, window_bounds = array<i64: 1, 3, 324>}, {transform_indices = @transform_2, window_bounds = array<i64: 1, 3, 324>}]} {
    %c0 = arith.constant 0 : index
    %c0_0 = arith.constant 0 : index
    %c0_1 = arith.constant 0 : index
    %0 = vector.load %arg3[%c0, %c0_0, %c0_1] : memref<1x3x324xf32, #tpu.memory_space<vmem>>, vector<1x1x324xf32>
    %1 = vector.shape_cast %0 : vector<1x1x324xf32> to vector<1x324xf32>
    %c0_2 = arith.constant 0 : index
    %c0_3 = arith.constant 0 : index
    %2 = vector.load %arg2[%c0_2, %c0_3] : memref<3x4xf32, #tpu.memory_space<vmem>>, vector<3x1xf32>
    %3 = vector.broadcast %1 : vector<1x324xf32> to vector<3x324xf32>
    %4 = vector.broadcast %2 : vector<3x1xf32> to vector<3x324xf32>
    %5 = arith.mulf %3, %4 : vector<3x324xf32>
    %c0_4 = arith.constant 0 : index
    %c1 = arith.constant 1 : index
    %c0_5 = arith.constant 0 : index
    %6 = vector.load %arg3[%c0_4, %c1, %c0_5] : memref<1x3x324xf32, #tpu.memory_space<vmem>>, vector<1x1x324xf32>
    %7 = vector.shape_cast %6 : vector<1x1x324xf32> to vector<1x324xf32>
    %c0_6 = arith.constant 0 : index
    %c1_7 = arith.constant 1 : index
    %8 = vector.load %arg2[%c0_6, %c1_7] : memref<3x4xf32, #tpu.memory_space<vmem>>, vector<3x1xf32>
    %9 = vector.broadcast %7 : vector<1x324xf32> to vector<3x324xf32>
    %10 = vector.broadcast %8 : vector<3x1xf32> to vector<3x324xf32>
    %11 = arith.mulf %9, %10 : vector<3x324xf32>
    %12 = arith.addf %5, %11 : vector<3x324xf32>
    %c0_8 = arith.constant 0 : index
    %c2 = arith.constant 2 : index
    %c0_9 = arith.constant 0 : index
    %13 = vector.load %arg3[%c0_8, %c2, %c0_9] : memref<1x3x324xf32, #tpu.memory_space<vmem>>, vector<1x1x324xf32>
    %14 = vector.shape_cast %13 : vector<1x1x324xf32> to vector<1x324xf32>
    %c0_10 = arith.constant 0 : index
    %c2_11 = arith.constant 2 : index
    %15 = vector.load %arg2[%c0_10, %c2_11] : memref<3x4xf32, #tpu.memory_space<vmem>>, vector<3x1xf32>
    %16 = vector.broadcast %14 : vector<1x324xf32> to vector<3x324xf32>
    %17 = vector.broadcast %15 : vector<3x1xf32> to vector<3x324xf32>
    %18 = arith.mulf %16, %17 : vector<3x324xf32>
    %19 = arith.addf %12, %18 : vector<3x324xf32>
    %c0_12 = arith.constant 0 : index
    %c3 = arith.constant 3 : index
    %20 = vector.load %arg2[%c0_12, %c3] : memref<3x4xf32, #tpu.memory_space<vmem>>, vector<3x1xf32>
    %21 = vector.broadcast %20 : vector<3x1xf32> to vector<3x324xf32>
    %22 = arith.addf %19, %21 : vector<3x324xf32>
    %c0_13 = arith.constant 0 : index
    %c0_14 = arith.constant 0 : index
    %c0_15 = arith.constant 0 : index
    %23 = vector.load %arg4[%c0_13, %c0_14, %c0_15] : memref<1x3x324xf32, #tpu.memory_space<vmem>>, vector<1x3x324xf32>
    %24 = vector.shape_cast %23 : vector<1x3x324xf32> to vector<3x324xf32>
    %25 = vector.shape_cast %22 : vector<3x324xf32> to vector<1x3x324xf32>
    tpu.vector_store %arg4[%c0_13, %c0_14, %c0_15], %25 {strides = array<i32>} : memref<1x3x324xf32, #tpu.memory_space<vmem>>, vector<1x3x324xf32>,
    return
  }
  func.func @transform_0(%arg0: i32, %arg1: i32) -> (i32, i32) {
    %c0_i32 = arith.constant 0 : i32
    %c0_i32_0 = arith.constant 0 : i32
    %c0_i32_1 = arith.constant 0 : i32
    return %c0_i32, %c0_i32_0 : i32, i32
  }
  func.func @transform_1(%arg0: i32, %arg1: i32) -> (i32, i32, i32) {
    %c0_i32 = arith.constant 0 : i32
    %c0_i32_0 = arith.constant 0 : i32
    return %arg0, %c0_i32, %arg1 : i32, i32, i32
  }
  func.func @transform_2(%arg0: i32, %arg1: i32) -> (i32, i32, i32) {
    %c0_i32 = arith.constant 0 : i32
    %c0_i32_0 = arith.constant 0 : i32
    return %arg0, %c0_i32, %arg1 : i32, i32, i32
  }
}

</mosaic_0001>

<bundles_post_ra>
// kernel: model_forward.1
= control target key start
LH: loop header
LB: loop body
LE: loop exit
PB: predicated region body
PF: predicated region fallthrough
CT: control target
= control target key end

     0   :  { %s454_s9 = smov 0   ;;  %s456_s10 = smov 0   ;;  %s497_s0 = inlined_call_operand.vmem [shape: f32[3,4], index: 0, kind: input, shape index: {}]   ;;  %s498_s1 = inlined_call_operand.vmem [shape: f32[2,3,324], index: 1, kind: input, shape index: {}]   ;;  %s499_s2 = inlined_call_operand.vmem [shape: f32[2,3,324], index: 2, kind: output, shape index: {}]  }
   0x1   :  { %s458_s11 = smov 0  }
   0x2 LB: > { %s24_s12 = sadd.s32 1, %s429_s10  ;;  %p370_p0 = scmp.ge.s32.totalorder %s433_s11, 1  ;;  %s433_s11 = sphi %s458_s11, %s12_s11   ;;  %s429_s10 = sphi %s456_s10, %s501_s10   ;;  %s425_s9 = sphi %s454_s9, %s500_s9  }
   0x3   : > { %p26_p1 = scmp.ge.s32.totalorder %s24_s12, 2  ;;  %p133_p2 = scmp.lt.s32.totalorder %s433_s11, 3 }
   0x5   : > { %s503_s12 = smov (%p26_p1, %s24_s12), 0  ;;  %p134_p3 = pnand %p370_p0, %p133_p2 }
   0x6   : > { %p164_p4 = scmp.lt.s32.totalorder (!%p134_p3), %s425_s9, 1 }
   0x7   : > { %137 = sbr.rel (%p134_p3) target bundleno = 154 (0x9a), region = 28 }
   0xc   : > { %v184_v0 = vld [vmem:[%s497_s0] sm:$0x7]  ;;  %v435_v1 = vmov 0   ;;  %v436_v2 = vmov 2   ;;  %v437_v3 = vmov 1   ;;  %v438_v4 = vmov 3  }
   0xd   : > { %406 = vset.pattern.permute.xlu0 %v435_v1  ;;  %408 = vset.pattern.permute.xlu1 %v436_v2  ;;  %s505_s9 = smov (!%p164_p4, %s425_s9), 1  ;;  %v186_v5 = vlaneseq  ;;  %vm277_vm0 = vcmask 550912  }
   0xe   : > { %203 = vperm.xlu0 %406, %v184_v0   ;;  %256 = vperm.xlu1 %408, %v184_v0   ;;  %s377_s15 = smul.u32 12, %s505_s9 }
   0xf   : > { %v187_v6 = vshrl.u32 %v186_v5, 7 }
  0x10   : > { %s171_s18 = scalar_lea.vmem %s498_s1, %s377_s15  ;;  %s181_s21 = scalar_lea.vmem %s499_s2, %s377_s15 }
  0x11   : > { %v188_v7 = vsub.s32 0, %v187_v6  ;;  %v192_v8 = vsub.s32 1, %v187_v6  ;;  %v196_v9 = vsub.s32 2, %v187_v6  ;;  %v183_v10 = vld [vmem:[%s171_s18] ss:$4 sm:$0x7] }
  0x12   : > { %407 = vset.pattern.permute.xlu0 %v437_v3  ;;  %409 = vset.pattern.permute.xlu1 %v438_v4  ;;  %v374_v11 = vld [vmem:[%s171_s18 + $0x2] ss:$4 sm:$0x7]  ;;  %v373_v12 = vld [vmem:[%s171_s18 + $0x1] ss:$4 sm:$0x7] }
  0x13   : > { %228 = vperm.xlu0 %407, %v184_v0   ;;  %266 = vperm.xlu1 %409, %v184_v0   ;;  %v189_v14 = vrot.slane %v183_v10, %v188_v7  ;;  %v193_v15 = vrot.slane %v183_v10, %v192_v8  ;;  %v197_v16 = vrot.slane %v183_v10, %v196_v9 }
  0x14   : > { %v243_v17 = vrot.slane %v374_v11, %v188_v7  ;;  %v247_v18 = vrot.slane %v374_v11, %v192_v8  ;;  %v215_v19 = vrot.slane %v373_v12, %v188_v7  ;;  %v219_v20 = vrot.slane %v373_v12, %v192_v8 }
  0x15   : > { %v223_v21 = vrot.slane %v373_v12, %v196_v9  ;;  %v251_v23 = vrot.slane %v374_v11, %v196_v9 }
  0x17   : > { %410 = vset.pattern.permute.xlu0 %v438_v4 }
  0x89   : > { %v204_v13 = vpop.permute.xlu0 %203  ;;  %v257_v22 = vpop.permute.xlu1 %256 }
  0x8a   : > { %v206_v24 = vmul.f32 %v204_v13, %v189_v14  ;;  %v207_v25 = vmul.f32 %v204_v13, %v193_v15  ;;  %v208_v26 = vmul.f32 %v204_v13, %v197_v16  ;;  %v259_v28 = vmul.f32 %v257_v22, %v243_v17 }
  0x8b   : > { %v260_v29 = vmul.f32 %v257_v22, %v247_v18  ;;  %v261_v33 = vmul.f32 %v257_v22, %v251_v23 }
  0x8e   : > { %v229_v27 = vpop.permute.xlu0 %228  ;;  %v267_v37 = vpop.permute.xlu1 %266 }
  0x8f   : > { %v231_v30 = vmul.f32 %v229_v27, %v215_v19  ;;  %v232_v31 = vmul.f32 %v229_v27, %v219_v20  ;;  %v233_v32 = vmul.f32 %v229_v27, %v223_v21 }
  0x91   : > { %v234_v34 = vadd.f32 %v231_v30, %v206_v24  ;;  %v235_v35 = vadd.f32 %v232_v31, %v207_v25  ;;  %v236_v36 = vadd.f32 %v233_v32, %v208_v26 }
  0x93   : > { %v262_v38 = vadd.f32 %v259_v28, %v234_v34  ;;  %v263_v39 = vadd.f32 %v260_v29, %v235_v35  ;;  %v264_v40 = vadd.f32 %v261_v33, %v236_v36 }
  0x95   : > { %v269_v41 = vadd.f32 %v267_v37, %v262_v38  ;;  %v270_v42 = vadd.f32 %v267_v37, %v263_v39  ;;  %v271_v43 = vadd.f32 %v267_v37, %v264_v40 }
  0x97   : > { %v274_v44 = vcombine.low %v269_v41, %v270_v42  ;;  %278 = vst.msk [vmem:[%s181_s21 + $0x8] sm:$0x7] %vm277_vm0, %v271_v43 }
  0x99   : > { %276 = vst [vmem:[%s181_s21] sm:$0x77] %v274_v44 }
  0x9a PF: > { %s12_s11 = sadd.s32 1, %s433_s11   ;;  %s500_s9 = smov %s429_s10 }
  0x9b   : > { %p9_p5 = scmp.ge.s32.totalorder %s12_s11, 4   ;;  %s501_s10 = smov %s503_s12 }
  0x9d   :  { %11 = sbr.rel (!%p9_p5) target bundleno = 2 (0x2), region = 60 }

</bundles_post_ra>
